<compile_context>
chip_gen: v7x
topology: tpu7x:2x2x1
jax: 0.10.0
libtpu: 0.0.40
codegen_flags: <defaults>
</compile_context>

<pallas_src>
import math

import jax
import jax.numpy as jnp
from jax import lax
from jax.experimental import pallas as pl
from jax.experimental.pallas import tpu as pltpu

# ----------------------------- small synthetic config -----------------------
POOLING_DIM = 64            # CONTEXT_POOLING_DIM (4096 in the real config)
HIDDEN_DIM = 32             # CONTEXT_HIDDEN_DIM (512 in the real config)
ORT_DIM = 200               # fixed in module: get_ort_embeds(num_obj_cls, 200)
SPT_DIM = 64                # Boxes_Encode output width
D = POOLING_DIM + SPT_DIM   # 128, the "pooling_dim + 64" relation-rep width
MLP_DIM = 128               # self.mlp_dim (2048 in the real module)
NUM_OBJ_CLS = 16
NUM_REL_CLS = 8
BOX_DIM = 5                 # transfered_boxes width
LANE = 128                  # lane-dense output / slab width
RB = 128                    # [roi | box | zero-pad] input slab width
TARGET_ROW_TILE = 128       # rows per grid step (MXU M); capped for 2-step grids


# ----------------------------- misc helpers ----------------------------------
def _round_up(n, m):
    return ((n + m - 1) // m) * m


def _choose_row_tile(n, target=TARGET_ROW_TILE):
    """Row tile: big enough to fill the MXU M dim, but keep >=2 grid steps
    (v7x has 2 TensorCores sharing the 'parallel' row axis)."""
    npad8 = _round_up(max(int(n), 1), 8)
    tile = min(target, npad8)
    if npad8 // tile < 2 and npad8 >= 16:
        tile = _round_up(npad8 // 2, 8)
    npad = _round_up(npad8, tile)
    return tile, npad


def _pad_rows(x, n_to):
    n = x.shape[0]
    if n == n_to:
        return x
    return jnp.concatenate(
        [x, jnp.zeros((n_to - n,) + x.shape[1:], x.dtype)], axis=0)


def _pad_cols(x, w_to):
    w = x.shape[-1]
    if w == w_to:
        return x
    return jnp.concatenate(
        [x, jnp.zeros(x.shape[:-1] + (w_to - w,), x.dtype)], axis=-1)


def _split_rows(x, sizes):
    out, off = [], 0
    for s in sizes:
        out.append(x[off:off + s])
        off += s
    return out


def _row_spec(tile, width):
    return pl.BlockSpec((tile, width), lambda i: (i, 0))


def _const_spec(shape):
    # weight / bias resident across the row grid axis
    return pl.BlockSpec(shape, lambda i: (0, 0))


def _cparams(weight_arrays, act_bytes_per_step):
    wbytes = sum(int(a.size) * a.dtype.itemsize for a in weight_arrays)
    vmem = 2 * wbytes + 2 * int(act_bytes_per_step) + (2 << 20)
    vmem = int(min(max(vmem, 16 << 20), 48 << 20))
    return pltpu.CompilerParams(dimension_semantics=("parallel",),
                                vmem_limit_bytes=vmem)


def _cost(flops, transcendentals, arrays, out_bytes):
    ba = int(sum(int(a.size) * a.dtype.itemsize for a in arrays)) + int(out_bytes)
    return pl.CostEstimate(flops=int(flops), transcendentals=int(transcendentals),
                           bytes_accessed=ba)


# ----------------------------- Pallas kernels --------------------------------
def _obj_so_kernel(roibox_ref, wcls_ref, bcls_ref, wedge_ref, bedge_ref,
                   w_rb_ref, emb_low_ref, w_high_ref, b_obj_ref,
                   w_so_ref, b_so_ref,
                   dists_ref, so_ref):
    # Fused: context stub (obj logits + edge ctx) -> in-kernel argmax ->
    # one-hot ort-embedding fold -> merge_obj_low/high -> post_emb_s|o.
    # TODO(synk): LSTMContext (Motifs) source not provided; the context layer
    # here is a deterministic linear stand-in producing obj_dists / edge_ctx.
    rb = roibox_ref[...].astype(jnp.bfloat16)                       # (T, 128)

    dists = (jnp.dot(rb, wcls_ref[...], preferred_element_type=jnp.float32)
             + bcls_ref[...])                                       # (T, 128)
    dists_ref[...] = dists
    edge = (jnp.dot(rb, wedge_ref[...], preferred_element_type=jnp.float32)
            + bedge_ref[...])                                       # (T, 128)

    # obj_preds = argmax(dists[:, 1:NUM_OBJ_CLS]) + 1  (first-max semantics)
    col = lax.broadcasted_iota(jnp.int32, dists.shape, 1)
    valid = (col >= 1) & (col < NUM_OBJ_CLS)
    masked = jnp.where(valid, dists, -1e30)
    m = jnp.max(masked, axis=-1, keepdims=True)
    pred = jnp.min(jnp.where(masked >= m, col, LANE), axis=-1, keepdims=True)
    onehot = (col == pred).astype(jnp.bfloat16)                     # (T, 128)

    # obj_features = merge_obj_low(cat(roi, obj_embed, boxes)) + merge_obj_high(edge)
    #   roi|box handled by the merged lane-dense slab/weight (w_rb),
    #   obj_embed handled by onehot @ (ort_embedding @ w_low_emb)  (emb_low).
    obj_feat = (jnp.dot(rb, w_rb_ref[...], preferred_element_type=jnp.float32)
                + jnp.dot(onehot, emb_low_ref[...],
                          preferred_element_type=jnp.float32)
                + jnp.dot(edge.astype(jnp.bfloat16), w_high_ref[...],
                          preferred_element_type=jnp.float32)
                + b_obj_ref[...])                                   # (T, P)

    # post_emb_s / post_emb_o merged into one (P, 2P) matmul -> [subj | obj]
    so_ref[...] = (jnp.dot(obj_feat.astype(jnp.bfloat16), w_so_ref[...],
                           preferred_element_type=jnp.float32) + b_so_ref[...])


def _triplet_kernel(subj_ref, obj_ref, union_ref,
                    w_rel_ref, b_rel_ref, ln_g_ref, ln_b_ref,
                    w1_ref, b1_ref, w2_ref, b2_ref, wn_ref,
                    out_ref):
    # subj/obj are padded with ones and union is concatenated with the spatial
    # feats in the wrapper, so the elementwise product IS the full prod_reps
    # (no in-kernel concatenate, lane-dense D = 128).
    prod = subj_ref[...] * obj_ref[...] * union_ref[...]            # (T, D) f32

    # linear_rel_rep + ReLU  (dropout = identity in eval)
    r = jnp.maximum(
        jnp.dot(prod.astype(jnp.bfloat16), w_rel_ref[...],
                preferred_element_type=jnp.float32) + b_rel_ref[...], 0.0)
    t = r + prod                                                    # residual

    # norm_rel_rep (LayerNorm, eps = 1e-5)
    mu = jnp.mean(t, axis=-1, keepdims=True)
    var = jnp.mean((t - mu) ** 2, axis=-1, keepdims=True)
    t = (t - mu) * lax.rsqrt(var + 1e-5) * ln_g_ref[...] + ln_b_ref[...]

    # project_head_1(relu(t)):  Linear(D, MLP) -> ReLU -> Linear(MLP, D)
    t = jnp.maximum(t, 0.0)
    h = jnp.maximum(
        jnp.dot(t.astype(jnp.bfloat16), w1_ref[...],
                preferred_element_type=jnp.float32) + b1_ref[...], 0.0)
    x = (jnp.dot(h.astype(jnp.bfloat16), w2_ref[...],
                 preferred_element_type=jnp.float32) + b2_ref[...])

    # rel_dists = exp(logit_scale) * normalize(x) @ normalize(w).T
    # (w-side path hoisted offline into wn_ref, stored bf16; bf16 x bf16 dot
    #  with f32 accumulation.)
    xn = x * lax.rsqrt(jnp.maximum(jnp.sum(x * x, axis=-1, keepdims=True), 1e-24))
    out_ref[...] = jnp.dot(xn.astype(jnp.bfloat16), wn_ref[...],
                           preferred_element_type=jnp.float32)


# ----------------------------- kernel wrappers --------------------------------
def obj_so_call(roibox_pad, tile, kp):
    npad = roibox_pad.shape[0]
    grid = (npad // tile,)
    weights = [kp["w_ctx_cls"], kp["w_ctx_edge"], kp["w_rb"], kp["emb_low"],
               kp["w_high"], kp["w_so"]]
    flops = 2 * npad * (RB * LANE * 2 + RB * POOLING_DIM + LANE * POOLING_DIM * 2
                        + POOLING_DIM * 2 * POOLING_DIM)
    ce = _cost(flops, 0, [roibox_pad] + weights,
               out_bytes=npad * (LANE + 2 * POOLING_DIM) * 4)
    return pl.pallas_call(
        _obj_so_kernel,
        grid=grid,
        in_specs=[_row_spec(tile, RB),
                  _const_spec(kp["w_ctx_cls"].shape), _const_spec(kp["b_ctx_cls"].shape),
                  _const_spec(kp["w_ctx_edge"].shape), _const_spec(kp["b_ctx_edge"].shape),
                  _const_spec(kp["w_rb"].shape), _const_spec(kp["emb_low"].shape),
                  _const_spec(kp["w_high"].shape), _const_spec(kp["b_obj"].shape),
                  _const_spec(kp["w_so"].shape), _const_spec(kp["b_so"].shape)],
        out_specs=(_row_spec(tile, LANE), _row_spec(tile, 2 * POOLING_DIM)),
        out_shape=(jax.ShapeDtypeStruct((npad, LANE), jnp.float32),
                   jax.ShapeDtypeStruct((npad, 2 * POOLING_DIM), jnp.float32)),
        compiler_params=_cparams(weights, tile * (RB + LANE + 2 * POOLING_DIM) * 4),
        cost_estimate=ce,
    )(roibox_pad,
      kp["w_ctx_cls"], kp["b_ctx_cls"], kp["w_ctx_edge"], kp["b_ctx_edge"],
      kp["w_rb"], kp["emb_low"], kp["w_high"], kp["b_obj"],
      kp["w_so"], kp["b_so"])


def triplet_call(subj_cat, obj_cat, union_cat, tile, kp):
    npad = subj_cat.shape[0]
    grid = (npad // tile,)
    weights = [kp["w_rel"], kp["ph1_w1"], kp["ph1_w2"], kp["wn_T"]]
    flops = 2 * npad * (D * D + D * MLP_DIM + MLP_DIM * D + D * LANE)
    ce = _cost(flops, 4 * npad, [subj_cat, obj_cat, union_cat] + weights,
               out_bytes=npad * LANE * 4)
    return pl.pallas_call(
        _triplet_kernel,
        grid=grid,
        in_specs=[_row_spec(tile, D), _row_spec(tile, D), _row_spec(tile, D),
                  _const_spec(kp["w_rel"].shape), _const_spec(kp["b_rel"].shape),
                  _const_spec(kp["ln_g"].shape), _const_spec(kp["ln_b"].shape),
                  _const_spec(kp["ph1_w1"].shape), _const_spec(kp["ph1_b1"].shape),
                  _const_spec(kp["ph1_w2"].shape), _const_spec(kp["ph1_b2"].shape),
                  _const_spec(kp["wn_T"].shape)],
        out_specs=_row_spec(tile, LANE),
        out_shape=jax.ShapeDtypeStruct((npad, LANE), jnp.float32),
        compiler_params=_cparams(weights, tile * (3 * D + LANE) * 4),
        cost_estimate=ce,
    )(subj_cat, obj_cat, union_cat,
      kp["w_rel"], kp["b_rel"], kp["ln_g"], kp["ln_b"],
      kp["ph1_w1"], kp["ph1_b1"], kp["ph1_w2"], kp["ph1_b2"], kp["wn_T"])


# ----------------------------- glue (plain JAX) --------------------------------
def get_ort_embeds(k, dims):
    ind = jnp.arange(1, k + 1, dtype=jnp.float32)[:, None]
    lin = jnp.linspace(-math.pi, math.pi, dims, dtype=jnp.float32)[None, :]
    t = ind * lin
    return jnp.sin(t) + jnp.cos(t)


def boxes_encode(bboxes, rel_pair_idx, w, h):
    # TODO(synk): Boxes_Encode module source not provided; deterministic
    # geometric pair encoding tiled to SPT_DIM used as a stand-in.
    scale = jnp.array([w, h, w, h], jnp.float32)
    b = bboxes / scale
    s = b[rel_pair_idx[:, 0]]
    o = b[rel_pair_idx[:, 1]]
    base = jnp.concatenate([s, o], axis=-1)            # (Nr, 8)
    return jnp.tile(base, (1, SPT_DIM // 8))           # (Nr, 64)


def coc_predictor_forward(kp, proposals, rel_pair_idxs,
                          roi_features, union_features):
    num_objs = [p["bbox"].shape[0] for p in proposals]
    num_rels = [r.shape[0] for r in rel_pair_idxs]
    n_obj, n_rel = sum(num_objs), sum(num_rels)

    # --- per-image transfered boxes ---
    tb = []
    for prop in proposals:
        bb = prop["bbox"]
        w, h = prop["size"]
        tb.append(jnp.stack(
            (bb[:, 0] / w, bb[:, 3] / h, bb[:, 2] / w, bb[:, 1] / h,
             (bb[:, 2] - bb[:, 0]) * (bb[:, 3] - bb[:, 1]) / w / h), axis=-1))
    tboxes = jnp.concatenate(tb, axis=0)                            # (n_obj, 5)

    # --- fused context-stub + object fusion + subj/obj projection (Pallas) ---
    tile_o, np_obj = _choose_row_tile(n_obj)
    roibox = _pad_cols(jnp.concatenate([roi_features, tboxes], axis=-1), RB)
    roibox_pad = _pad_rows(roibox, np_obj)
    obj_dists_pad, so_pad = obj_so_call(roibox_pad, tile_o, kp)
    obj_dists = obj_dists_pad[:n_obj, :NUM_OBJ_CLS]

    # --- global pair indices + spatial feats (glue) ---
    subj_idx, obj_idx, spt_all = [], [], []
    off = 0
    for i, prop in enumerate(proposals):
        idx = rel_pair_idxs[i]
        if idx.shape[0] == 0:
            off += num_objs[i]
            continue
        w, h = prop["size"]
        spt_all.append(boxes_encode(prop["bbox"], idx, w, h))
        subj_idx.append(idx[:, 0] + off)
        obj_idx.append(idx[:, 1] + off)
        off += num_objs[i]
    subj_idx = jnp.concatenate(subj_idx, axis=0)
    obj_idx = jnp.concatenate(obj_idx, axis=0)
    spt_all = jnp.concatenate(spt_all, axis=0)

    # TODO(synk): subj/obj row gather stays in XLA; at real (4096-dim) scale it
    # should be fused into the triplet kernel via scalar-prefetch / DMA gather.
    ones_spt = jnp.ones((n_rel, SPT_DIM), jnp.float32)
    subj_cat = jnp.concatenate([so_pad[subj_idx, :POOLING_DIM], ones_spt], -1)
    obj_cat = jnp.concatenate([so_pad[obj_idx, POOLING_DIM:], ones_spt], -1)
    union_cat = jnp.concatenate([union_features, spt_all], -1)      # (n_rel, D)

    # --- fused triplet features + relation logits (Pallas) ---
    tile_r, np_rel = _choose_row_tile(n_rel)
    rel_pad = triplet_call(_pad_rows(subj_cat, np_rel),
                           _pad_rows(obj_cat, np_rel),
                           _pad_rows(union_cat, np_rel), tile_r, kp)
    rel_dists = rel_pad[:n_rel, :NUM_REL_CLS]
    # (USE_GT_BOX == True -> no FrequencyBias term)

    add_losses = {}
    return (_split_rows(obj_dists, num_objs),
            _split_rows(rel_dists, num_rels),
            add_losses)


# ----------------------------- parameter init --------------------------------
def _xavier(key, shape):
    limit = math.sqrt(6.0 / (shape[0] + shape[1]))
    return jax.random.uniform(key, shape, jnp.float32, -limit, limit)


def init_params(key):
    """Logical (PyTorch-shaped, f32) module parameters."""
    ks = jax.random.split(key, 16)
    low_in = POOLING_DIM + ORT_DIM + BOX_DIM
    p = {}
    # context stub
    p["w_ctx_cls"] = _xavier(ks[0], (POOLING_DIM, NUM_OBJ_CLS))
    p["b_ctx_cls"] = jnp.zeros((1, NUM_OBJ_CLS), jnp.float32)
    p["w_ctx_edge"] = _xavier(ks[1], (POOLING_DIM, HIDDEN_DIM))
    p["b_ctx_edge"] = jnp.zeros((1, HIDDEN_DIM), jnp.float32)
    # merge_obj_low / merge_obj_high / post_emb_s / post_emb_o
    p["w_low"] = _xavier(ks[2], (low_in, POOLING_DIM))
    p["b_low"] = jnp.zeros((1, POOLING_DIM), jnp.float32)
    p["w_high"] = _xavier(ks[3], (HIDDEN_DIM, POOLING_DIM))
    p["b_high"] = jnp.zeros((1, POOLING_DIM), jnp.float32)
    p["w_s"] = _xavier(ks[4], (POOLING_DIM, POOLING_DIM))
    p["b_s"] = jnp.zeros((1, POOLING_DIM), jnp.float32)
    p["w_o"] = _xavier(ks[5], (POOLING_DIM, POOLING_DIM))
    p["b_o"] = jnp.zeros((1, POOLING_DIM), jnp.float32)
    # linear_rel_rep + LayerNorm
    p["w_rel"] = _xavier(ks[6], (D, D))
    p["b_rel"] = jnp.zeros((1, D), jnp.float32)
    p["ln_g"] = jnp.ones((1, D), jnp.float32)
    p["ln_b"] = jnp.zeros((1, D), jnp.float32)
    # project_head_1 / project_head_2 (MLP: D -> MLP_DIM -> D)
    p["ph1_w1"] = _xavier(ks[7], (D, MLP_DIM))
    p["ph1_b1"] = jnp.zeros((1, MLP_DIM), jnp.float32)
    p["ph1_w2"] = _xavier(ks[8], (MLP_DIM, D))
    p["ph1_b2"] = jnp.zeros((1, D), jnp.float32)
    p["ph2_w1"] = _xavier(ks[9], (D, MLP_DIM))
    p["ph2_b1"] = jnp.zeros((1, MLP_DIM), jnp.float32)
    p["ph2_w2"] = _xavier(ks[10], (MLP_DIM, D))
    p["ph2_b2"] = jnp.zeros((1, D), jnp.float32)
    # rel_compress (xavier), logit_scale, ort embedding (non-trainable)
    p["rel_compress"] = _xavier(ks[11], (NUM_REL_CLS, D))
    p["logit_scale"] = jnp.array([math.log(1.0 / 0.07)], jnp.float32)
    p["ort_embedding"] = get_ort_embeds(NUM_OBJ_CLS, ORT_DIM)
    return p


def prepare_kernel_params(p):
    """One-time, parameter-only transforms:
      * bf16 casts, lane-dense padding
      * roi|box slab weight merge (w_rb) and post_emb_s|o merge (w_so)
      * ort_embedding folded through the merge_obj_low embedding slice (emb_low)
      * b_low + b_high pre-summed
      * hoisted, x-independent classifier path:
        project_head_2(relu(rel_compress)) -> L2-normalize -> * exp(logit_scale),
        transposed, class-dim padded to 128, stored bf16 (wn_T)."""
    bf = lambda a: a.astype(jnp.bfloat16)
    kp = {}
    # context stub: rows padded from P to RB (box/pad rows zero), cols to LANE
    kp["w_ctx_cls"] = bf(_pad_rows(_pad_cols(p["w_ctx_cls"], LANE), RB))
    kp["b_ctx_cls"] = _pad_cols(p["b_ctx_cls"], LANE)
    kp["w_ctx_edge"] = bf(_pad_rows(_pad_cols(p["w_ctx_edge"], LANE), RB))
    kp["b_ctx_edge"] = _pad_cols(p["b_ctx_edge"], LANE)
    # merge_obj_low rows ordered [roi (P) | emb (200) | box (5)] in PyTorch
    w_low_roi = p["w_low"][:POOLING_DIM]
    w_low_emb = p["w_low"][POOLING_DIM:POOLING_DIM + ORT_DIM]
    w_low_box = p["w_low"][POOLING_DIM + ORT_DIM:]
    kp["w_rb"] = bf(_pad_rows(jnp.concatenate([w_low_roi, w_low_box], axis=0), RB))
    kp["emb_low"] = bf(_pad_rows(p["ort_embedding"] @ w_low_emb, LANE))
    kp["w_high"] = bf(_pad_rows(p["w_high"], LANE))
    kp["b_obj"] = p["b_low"] + p["b_high"]
    kp["w_so"] = bf(jnp.concatenate([p["w_s"], p["w_o"]], axis=1))
    kp["b_so"] = jnp.concatenate([p["b_s"], p["b_o"]], axis=1)
    # linear_rel_rep / LayerNorm / project_head_1
    kp["w_rel"] = bf(p["w_rel"]); kp["b_rel"] = p["b_rel"]
    kp["ln_g"] = p["ln_g"]; kp["ln_b"] = p["ln_b"]
    kp["ph1_w1"] = bf(p["ph1_w1"]); kp["ph1_b1"] = p["ph1_b1"]
    kp["ph1_w2"] = bf(p["ph1_w2"]); kp["ph1_b2"] = p["ph1_b2"]
    # hoisted classifier path (dropout = identity in eval)
    rc = jnp.maximum(p["rel_compress"], 0.0)
    h = jnp.maximum(rc @ p["ph2_w1"] + p["ph2_b1"], 0.0)
    w = h @ p["ph2_w2"] + p["ph2_b2"]
    wn = w * lax.rsqrt(jnp.maximum(jnp.sum(w * w, axis=-1, keepdims=True), 1e-24))
    wn_t = (jnp.exp(p["logit_scale"][0]) * wn).T                    # (D, NUM_REL_CLS)
    kp["wn_T"] = bf(_pad_cols(wn_t, LANE))                          # (D, 128) bf16
    return kp


# ----------------------------- main -------------------------------------------
if __name__ == "__main__":
    key = jax.random.PRNGKey(0)
    params = init_params(key)
    kparams = prepare_kernel_params(params)   # once per parameter set

    num_objs = [5, 6]
    num_rels = [4, 6]
    ks = jax.random.split(jax.random.PRNGKey(1), 8)

    roi_features = jax.random.normal(ks[0], (sum(num_objs), POOLING_DIM), jnp.float32)
    union_features = jax.random.normal(ks[1], (sum(num_rels), POOLING_DIM), jnp.float32)

    proposals = []
    rel_pair_idxs = []
    for i, (no, nr) in enumerate(zip(num_objs, num_rels)):
        w, h = 32.0, 24.0
        xy = jax.random.uniform(ks[2 + i], (no, 2), jnp.float32, 0.0, 12.0)
        wh = jax.random.uniform(ks[4 + i], (no, 2), jnp.float32, 2.0, 10.0)
        bbox = jnp.concatenate([xy, xy + wh], axis=-1)   # x1,y1,x2,y2
        proposals.append({"bbox": bbox, "size": (w, h)})
        rel_pair_idxs.append(
            jax.random.randint(ks[6 + i], (nr, 2), 0, no, jnp.int32))

    obj_dists, rel_dists, add_losses = coc_predictor_forward(
        kparams, proposals, rel_pair_idxs, roi_features, union_features)

    jax.block_until_ready(rel_dists)
    jax.block_until_ready(obj_dists)
    assert rel_dists[0].shape == (num_rels[0], NUM_REL_CLS)
    assert rel_dists[1].shape == (num_rels[1], NUM_REL_CLS)
    assert obj_dists[0].shape == (num_objs[0], NUM_OBJ_CLS)
    assert obj_dists[1].shape == (num_objs[1], NUM_OBJ_CLS)
    assert all(bool(jnp.all(jnp.isfinite(r))) for r in rel_dists)
    assert all(bool(jnp.all(jnp.isfinite(o))) for o in obj_dists)
    print("KERNEL_OK")
</pallas_src>

<mosaic_0001>
module attributes {stable_mosaic.version = 11 : i64} {
  func.func @_obj_so_kernel(%arg0: i32, %arg1: memref<8x128xf32, #tpu.memory_space<vmem>>, %arg2: memref<128x128xbf16, #tpu.memory_space<vmem>>, %arg3: memref<1x128xf32, #tpu.memory_space<vmem>>, %arg4: memref<128x128xbf16, #tpu.memory_space<vmem>>, %arg5: memref<1x128xf32, #tpu.memory_space<vmem>>, %arg6: memref<128x64xbf16, #tpu.memory_space<vmem>>, %arg7: memref<128x64xbf16, #tpu.memory_space<vmem>>, %arg8: memref<128x64xbf16, #tpu.memory_space<vmem>>, %arg9: memref<1x64xf32, #tpu.memory_space<vmem>>, %arg10: memref<64x128xbf16, #tpu.memory_space<vmem>>, %arg11: memref<1x128xf32, #tpu.memory_space<vmem>>, %arg12: memref<8x128xf32, #tpu.memory_space<vmem>>, %arg13: memref<8x128xf32, #tpu.memory_space<vmem>>) attributes {dimension_semantics = [#tpu.dimension_semantics<parallel>], iteration_bounds = array<i64: 2>, scalar_prefetch = 0 : i64, scratch_operands = 0 : i64, tpu.core_type = #tpu.core_type<tc>, window_params = [{transform_indices = @transform_0, window_bounds = array<i64: 8, 128>}, {pipeline_mode = #tpu.pipeline_mode<synchronous>, transform_indices = @transform_1, window_bounds = array<i64: 128, 128>}, {pipeline_mode = #tpu.pipeline_mode<synchronous>, transform_indices = @transform_2, window_bounds = array<i64: 1, 128>}, {pipeline_mode = #tpu.pipeline_mode<synchronous>, transform_indices = @transform_3, window_bounds = array<i64: 128, 128>}, {pipeline_mode = #tpu.pipeline_mode<synchronous>, transform_indices = @transform_4, window_bounds = array<i64: 1, 128>}, {pipeline_mode = #tpu.pipeline_mode<synchronous>, transform_indices = @transform_5, window_bounds = array<i64: 128, 64>}, {pipeline_mode = #tpu.pipeline_mode<synchronous>, transform_indices = @transform_6, window_bounds = array<i64: 128, 64>}, {pipeline_mode = #tpu.pipeline_mode<synchronous>, transform_indices = @transform_7, window_bounds = array<i64: 128, 64>}, {pipeline_mode = #tpu.pipeline_mode<synchronous>, transform_indices = @transform_8, window_bounds = array<i64: 1, 64>}, {pipeline_mode = #tpu.pipeline_mode<synchronous>, transform_indices = @transform_9, window_bounds = array<i64: 64, 128>}, {pipeline_mode = #tpu.pipeline_mode<synchronous>, transform_indices = @transform_10, window_bounds = array<i64: 1, 128>}, {transform_indices = @transform_11, window_bounds = array<i64: 8, 128>}, {transform_indices = @transform_12, window_bounds = array<i64: 8, 128>}]} {
    %c0 = arith.constant 0 : index
    %c0_0 = arith.constant 0 : index
    %0 = vector.load %arg1[%c0, %c0_0] : memref<8x128xf32, #tpu.memory_space<vmem>>, vector<8x128xf32>
    %1 = arith.truncf %0 : vector<8x128xf32> to vector<8x128xbf16>
    %c0_1 = arith.constant 0 : index
    %c0_2 = arith.constant 0 : index
    %2 = vector.load %arg2[%c0_1, %c0_2] : memref<128x128xbf16, #tpu.memory_space<vmem>>, vector<128x128xbf16>
    %cst = arith.constant dense<0.000000e+00> : vector<8x128xf32>
    %3 = tpu.matmul %1, %2, %cst {dimension_numbers = #tpu.dot_dimension_numbers<[1], [0], [0], [1], [0, 0, 1, 1], [], []>} : vector<8x128xbf16>, vector<128x128xbf16>, vector<8x128xf32> -> vector<8x128xf32>
    %c0_3 = arith.constant 0 : index
    %c0_4 = arith.constant 0 : index
    %4 = vector.load %arg3[%c0_3, %c0_4] : memref<1x128xf32, #tpu.memory_space<vmem>>, vector<1x128xf32>
    %5 = vector.broadcast %4 : vector<1x128xf32> to vector<8x128xf32>
    %6 = arith.addf %3, %5 : vector<8x128xf32>
    %c0_5 = arith.constant 0 : index
    %c0_6 = arith.constant 0 : index
    %7 = vector.load %arg12[%c0_5, %c0_6] : memref<8x128xf32, #tpu.memory_space<vmem>>, vector<8x128xf32>
    tpu.vector_store %arg12[%c0_5, %c0_6], %6 {strides = array<i32>} : memref<8x128xf32, #tpu.memory_space<vmem>>, vector<8x128xf32>,
    %c0_7 = arith.constant 0 : index
    %c0_8 = arith.constant 0 : index
    %8 = vector.load %arg4[%c0_7, %c0_8] : memref<128x128xbf16, #tpu.memory_space<vmem>>, vector<128x128xbf16>
    %cst_9 = arith.constant dense<0.000000e+00> : vector<8x128xf32>
    %9 = tpu.matmul %1, %8, %cst_9 {dimension_numbers = #tpu.dot_dimension_numbers<[1], [0], [0], [1], [0, 0, 1, 1], [], []>} : vector<8x128xbf16>, vector<128x128xbf16>, vector<8x128xf32> -> vector<8x128xf32>
    %c0_10 = arith.constant 0 : index
    %c0_11 = arith.constant 0 : index
    %10 = vector.load %arg5[%c0_10, %c0_11] : memref<1x128xf32, #tpu.memory_space<vmem>>, vector<1x128xf32>
    %11 = vector.broadcast %10 : vector<1x128xf32> to vector<8x128xf32>
    %12 = arith.addf %9, %11 : vector<8x128xf32>
    %13 = tpu.iota {dimensions = array<i32: 1>} : vector<8x128xi32>
    %c1_i32 = arith.constant 1 : i32
    %14 = vector.broadcast %c1_i32 : i32 to vector<8x128xi32>
    %15 = arith.cmpi sge, %13, %14 : vector<8x128xi32>
    %c16_i32 = arith.constant 16 : i32
    %16 = vector.broadcast %c16_i32 : i32 to vector<8x128xi32>
    %17 = arith.cmpi slt, %13, %16 : vector<8x128xi32>
    %18 = arith.andi %15, %17 : vector<8x128xi1>
    %cst_12 = arith.constant -1.000000e+30 : f32
    %19 = vector.broadcast %cst_12 : f32 to vector<8x128xf32>
    %20 = arith.select %18, %6, %19 : vector<8x128xi1>, vector<8x128xf32>
    %cst_13 = arith.constant dense<0xFF800000> : vector<8xf32>
    %21 = vector.multi_reduction <maximumf>, %20, %cst_13 [1] : vector<8x128xf32> to vector<8xf32>
    %22 = vector.shape_cast %21 : vector<8xf32> to vector<8x1xf32>
    %23 = vector.broadcast %22 : vector<8x1xf32> to vector<8x128xf32>
    %24 = arith.cmpf oge, %20, %23 : vector<8x128xf32>
    %c128_i32 = arith.constant 128 : i32
    %25 = vector.broadcast %c128_i32 : i32 to vector<8x128xi32>
    %26 = arith.select %24, %13, %25 : vector<8x128xi1>, vector<8x128xi32>
    %cst_14 = arith.constant dense<2147483647> : vector<8xi32>
    %27 = vector.multi_reduction <minsi>, %26, %cst_14 [1] : vector<8x128xi32> to vector<8xi32>
    %28 = vector.shape_cast %27 : vector<8xi32> to vector<8x1xi32>
    %29 = vector.broadcast %28 : vector<8x1xi32> to vector<8x128xi32>
    %30 = arith.cmpi eq, %13, %29 : vector<8x128xi32>
    %31 = arith.extui %30 : vector<8x128xi1> to vector<8x128xi32>
    %32 = arith.sitofp %31 : vector<8x128xi32> to vector<8x128xf32>
    %33 = arith.truncf %32 : vector<8x128xf32> to vector<8x128xbf16>
    %c0_15 = arith.constant 0 : index
    %c0_16 = arith.constant 0 : index
    %34 = vector.load %arg6[%c0_15, %c0_16] : memref<128x64xbf16, #tpu.memory_space<vmem>>, vector<128x64xbf16>
    %cst_17 = arith.constant dense<0.000000e+00> : vector<8x64xf32>
    %35 = tpu.matmul %1, %34, %cst_17 {dimension_numbers = #tpu.dot_dimension_numbers<[1], [0], [0], [1], [0, 0, 1, 1], [], []>} : vector<8x128xbf16>, vector<128x64xbf16>, vector<8x64xf32> -> vector<8x64xf32>
    %c0_18 = arith.constant 0 : index
    %c0_19 = arith.constant 0 : index
    %36 = vector.load %arg7[%c0_18, %c0_19] : memref<128x64xbf16, #tpu.memory_space<vmem>>, vector<128x64xbf16>
    %cst_20 = arith.constant dense<0.000000e+00> : vector<8x64xf32>
    %37 = tpu.matmul %33, %36, %cst_20 {dimension_numbers = #tpu.dot_dimension_numbers<[1], [0], [0], [1], [0, 0, 1, 1], [], []>} : vector<8x128xbf16>, vector<128x64xbf16>, vector<8x64xf32> -> vector<8x64xf32>
    %38 = arith.addf %35, %37 : vector<8x64xf32>
    %39 = arith.truncf %12 : vector<8x128xf32> to vector<8x128xbf16>
    %c0_21 = arith.constant 0 : index
    %c0_22 = arith.constant 0 : index
    %40 = vector.load %arg8[%c0_21, %c0_22] : memref<128x64xbf16, #tpu.memory_space<vmem>>, vector<128x64xbf16>
    %cst_23 = arith.constant dense<0.000000e+00> : vector<8x64xf32>
    %41 = tpu.matmul %39, %40, %cst_23 {dimension_numbers = #tpu.dot_dimension_numbers<[1], [0], [0], [1], [0, 0, 1, 1], [], []>} : vector<8x128xbf16>, vector<128x64xbf16>, vector<8x64xf32> -> vector<8x64xf32>
    %42 = arith.addf %38, %41 : vector<8x64xf32>
    %c0_24 = arith.constant 0 : index
    %c0_25 = arith.constant 0 : index
    %43 = vector.load %arg9[%c0_24, %c0_25] : memref<1x64xf32, #tpu.memory_space<vmem>>, vector<1x64xf32>
    %44 = vector.broadcast %43 : vector<1x64xf32> to vector<8x64xf32>
    %45 = arith.addf %42, %44 : vector<8x64xf32>
    %46 = arith.truncf %45 : vector<8x64xf32> to vector<8x64xbf16>
    %c0_26 = arith.constant 0 : index
    %c0_27 = arith.constant 0 : index
    %47 = vector.load %arg10[%c0_26, %c0_27] : memref<64x128xbf16, #tpu.memory_space<vmem>>, vector<64x128xbf16>
    %cst_28 = arith.constant dense<0.000000e+00> : vector<8x128xf32>
    %48 = tpu.matmul %46, %47, %cst_28 {dimension_numbers = #tpu.dot_dimension_numbers<[1], [0], [0], [1], [0, 0, 1, 1], [], []>} : vector<8x64xbf16>, vector<64x128xbf16>, vector<8x128xf32> -> vector<8x128xf32>
    %c0_29 = arith.constant 0 : index
    %c0_30 = arith.constant 0 : index
    %49 = vector.load %arg11[%c0_29, %c0_30] : memref<1x128xf32, #tpu.memory_space<vmem>>, vector<1x128xf32>
    %50 = vector.broadcast %49 : vector<1x128xf32> to vector<8x128xf32>
    %51 = arith.addf %48, %50 : vector<8x128xf32>
    %c0_31 = arith.constant 0 : index
    %c0_32 = arith.constant 0 : index
    %52 = vector.load %arg13[%c0_31, %c0_32] : memref<8x128xf32, #tpu.memory_space<vmem>>, vector<8x128xf32>
    tpu.vector_store %arg13[%c0_31, %c0_32], %51 {strides = array<i32>} : memref<8x128xf32, #tpu.memory_space<vmem>>, vector<8x128xf32>,
    return
  }
  func.func @transform_0(%arg0: i32) -> (i32, i32) {
    %c0_i32 = arith.constant 0 : i32
    %c0_i32_0 = arith.constant 0 : i32
    return %arg0, %c0_i32 : i32, i32
  }
  func.func @transform_1(%arg0: i32) -> (i32, i32) {
    %c0_i32 = arith.constant 0 : i32
    %c0_i32_0 = arith.constant 0 : i32
    %c0_i32_1 = arith.constant 0 : i32
    return %c0_i32, %c0_i32_0 : i32, i32
  }
  func.func @transform_2(%arg0: i32) -> (i32, i32) {
    %c0_i32 = arith.constant 0 : i32
    %c0_i32_0 = arith.constant 0 : i32
    %c0_i32_1 = arith.constant 0 : i32
    return %c0_i32, %c0_i32_0 : i32, i32
  }
  func.func @transform_3(%arg0: i32) -> (i32, i32) {
    %c0_i32 = arith.constant 0 : i32
    %c0_i32_0 = arith.constant 0 : i32
    %c0_i32_1 = arith.constant 0 : i32
    return %c0_i32, %c0_i32_0 : i32, i32
  }
  func.func @transform_4(%arg0: i32) -> (i32, i32) {
    %c0_i32 = arith.constant 0 : i32
    %c0_i32_0 = arith.constant 0 : i32
    %c0_i32_1 = arith.constant 0 : i32
    return %c0_i32, %c0_i32_0 : i32, i32
  }
  func.func @transform_5(%arg0: i32) -> (i32, i32) {
    %c0_i32 = arith.constant 0 : i32
    %c0_i32_0 = arith.constant 0 : i32
    %c0_i32_1 = arith.constant 0 : i32
    return %c0_i32, %c0_i32_0 : i32, i32
  }
  func.func @transform_6(%arg0: i32) -> (i32, i32) {
    %c0_i32 = arith.constant 0 : i32
    %c0_i32_0 = arith.constant 0 : i32
    %c0_i32_1 = arith.constant 0 : i32
    return %c0_i32, %c0_i32_0 : i32, i32
  }
  func.func @transform_7(%arg0: i32) -> (i32, i32) {
    %c0_i32 = arith.constant 0 : i32
    %c0_i32_0 = arith.constant 0 : i32
    %c0_i32_1 = arith.constant 0 : i32
    return %c0_i32, %c0_i32_0 : i32, i32
  }
  func.func @transform_8(%arg0: i32) -> (i32, i32) {
    %c0_i32 = arith.constant 0 : i32
    %c0_i32_0 = arith.constant 0 : i32
    %c0_i32_1 = arith.constant 0 : i32
    return %c0_i32, %c0_i32_0 : i32, i32
  }
  func.func @transform_9(%arg0: i32) -> (i32, i32) {
    %c0_i32 = arith.constant 0 : i32
    %c0_i32_0 = arith.constant 0 : i32
    %c0_i32_1 = arith.constant 0 : i32
    return %c0_i32, %c0_i32_0 : i32, i32
  }
  func.func @transform_10(%arg0: i32) -> (i32, i32) {
    %c0_i32 = arith.constant 0 : i32
    %c0_i32_0 = arith.constant 0 : i32
    %c0_i32_1 = arith.constant 0 : i32
    return %c0_i32, %c0_i32_0 : i32, i32
  }
  func.func @transform_11(%arg0: i32) -> (i32, i32) {
    %c0_i32 = arith.constant 0 : i32
    %c0_i32_0 = arith.constant 0 : i32
    return %arg0, %c0_i32 : i32, i32
  }
  func.func @transform_12(%arg0: i32) -> (i32, i32) {
    %c0_i32 = arith.constant 0 : i32
    %c0_i32_0 = arith.constant 0 : i32
    return %arg0, %c0_i32 : i32, i32
  }
}

</mosaic_0001>

<bundles_post_ra>
// kernel: tpu_custom_call.1
= control target key start
LH: loop header
LB: loop body
LE: loop exit
PB: predicated region body
PF: predicated region fallthrough
CT: control target
= control target key end

     0   :  { %s2038_s0 = inlined_call_operand.vmem [shape: f32[16,128], index: 0, kind: input, shape index: {}]   ;;  %s2039_s1 = inlined_call_operand.vmem [shape: bf16[128,128], index: 1, kind: input, shape index: {}]   ;;  %s2040_s2 = inlined_call_operand.vmem [shape: f32[1,128], index: 2, kind: input, shape index: {}]   ;;  %s2041_s3 = inlined_call_operand.vmem [shape: bf16[128,128], index: 3, kind: input, shape index: {}]   ;;  %s2042_s4 = inlined_call_operand.vmem [shape: f32[1,128], index: 4, kind: input, shape index: {}]   ;;  %s2043_s5 = inlined_call_operand.vmem [shape: bf16[128,64], index: 5, kind: input, shape index: {}]   ;;  %s2044_s6 = inlined_call_operand.vmem [shape: bf16[128,64], index: 6, kind: input, shape index: {}]   ;;  %s2045_s7 = inlined_call_operand.vmem [shape: bf16[128,64], index: 7, kind: input, shape index: {}]   ;;  %s2046_s8 = inlined_call_operand.vmem [shape: f32[1,64], index: 8, kind: input, shape index: {}]   ;;  %s2047_s9 = inlined_call_operand.vmem [shape: bf16[64,128], index: 9, kind: input, shape index: {}]   ;;  %s2048_s10 = inlined_call_operand.vmem [shape: f32[1,128], index: 10, kind: input, shape index: {}]   ;;  %s2049_s11 = inlined_call_operand.hbm [shape: f32[16,128], index: 11, kind: output, shape index: {0}]   ;;  %s2050_s12 = inlined_call_operand.hbm [shape: f32[16,128], index: 12, kind: output, shape index: {1}]  }
   0x1   :  { %2053 = sst [smem:[#allocation9_spill]] %s2038_s0 }
   0x2   :  { %2054 = sst [smem:[#allocation10_spill]] %s2039_s1 }
   0x3   :  { %2055 = sst [smem:[#allocation11_spill]] %s2040_s2 }
   0x4   :  { %18 = vsyncpa [#allocation3], 0 }
   0x5   :  { %20 = vsyncpa [#allocation3 + $0x1], 0 }
   0x6   :  { %21 = vsyncpa [#allocation5], 0 }
   0x7   :  { %23 = vsyncpa [#allocation5 + $0x1], 0  ;;  %s1688_s21 = smov 0   ;;  %s1690_s22 = smov 0  }
   0x8   :  { %s1692_s23 = smov 0   ;;  %s1694_s24 = smov 0  }
   0x9 LB: > { %s1709_s25 = sadd.s32 4294967295, %s1616_s24   ;;  %s1204_s26 = sadd.s32 4294967294, %s1616_s24   ;;  %s1616_s24 = sphi %s1694_s24, %s2068_s24   ;;  %s1612_s23 = sphi %s1692_s23, %s2067_s23   ;;  %s1608_s22 = sphi %s1690_s22, %s2066_s22   ;;  %s1604_s21 = sphi %s1688_s21, %s2065_s21  }
   0xa   : > { %s1713_s27 = sadd.s32 1, %s1616_s24   ;;  %s272_s28 = sadd.s32 1, %s1612_s23 }
   0xb   : > { %s269_s29 = ssub.s32 %s1616_s24, %s1713_s27  ;;  %p282_p0 = scmp.ne.s32.totalorder %s1612_s23, %s1608_s22 }
   0xc   : > { %p270_p1 = scmp.eq.s32.totalorder %s269_s29, 0  ;;  %p283_p2 = scmp.eq.s32.totalorder %s1709_s25, 1 }
   0xd   : > { %p288_p3 = scmp.ne.s32.totalorder %s1608_s22, %s1604_s21  ;;  %p289_p4 = scmp.eq.s32.totalorder %s1204_s26, 1 }
   0xe   : > { %s1724_s30 = scalar_select %p270_p1, %s1612_s23, %s272_s28  }
   0xf   : > { %p1726_p5 = por %p283_p2, %p282_p0  ;;  %p1730_p6 = por %p289_p4, %p288_p3 }
  0x10   : > { %2056 = sst [smem:[#allocation8_spill]] %s1724_s30  ;;  %p1207_p7 = scmp.ge.s32.totalorder %s1616_s24, 1 }
  0x11   : > { %p370_p8 = scmp.lt.s32.totalorder %s1616_s24, 3 }
  0x13   : > { %p371_p9 = pnand %p1207_p7, %p370_p8 }
  0x14   : > { %s2059_s1 = sld [smem:[#allocation10_spill]] (!%p371_p9)  ;;  %v1618_v1 = vmov (!%p371_p9), 0.0   ;;  %vm1619_vm0 = vmmov (!%p371_p9), 0   ;;  %p416_p10 = scmp.lt.s32.totalorder (!%p371_p9), %s1709_s25, 1  ;;  %v646_v11 = vlaneseq (!%p371_p9)  ;;  %v1486_v20 = vld [vmem:[%s2041_s3] sm:$0xff] (!%p371_p9)   ;;  %v1487_v21 = vld [vmem:[%s2041_s3 + $0x8] sm:$0xff] (!%p371_p9)  }
  0x15   : > { %374 = sbr.rel (%p371_p9) target bundleno = 1191 (0x4a7), region = 64  ;;  %1319 = vmatprep.subr.bf16.mxu0 (!%p371_p9), %v1618_v1  ;;  %1339 = vmatprep.subr.bf16.mxu1 (!%p371_p9), %v1618_v1  ;;  %s2060_s0 = sld [smem:[#allocation9_spill]] (!%p371_p9)  ;;  %v1488_v22 = vld [vmem:[%s2041_s3 + $0x10] sm:$0xff] (!%p371_p9)   ;;  %v1489_v23 = vld [vmem:[%s2041_s3 + $0x18] sm:$0xff] (!%p371_p9)   ;;  %v1490_v24 = vld [vmem:[%s2041_s3 + $0x20] sm:$0xff] (!%p371_p9)   ;;  %vm1036_vm8 = vcmask (!%p371_p9), 523264  }
  0x16   : > { %1335 = vmatprep.mubr.msk.bf16.mxu0 (!%p371_p9), %vm1619_vm0, %v1618_v1  ;;  %1355 = vmatprep.mubr.msk.bf16.mxu1 (!%p371_p9), %vm1619_vm0, %v1618_v1  ;;  %v1784_v12 = vand.u32 (!%p371_p9), 127, %v646_v11  ;;  %s2061_s2 = sld [smem:[#allocation11_spill]] (!%p371_p9)  ;;  %v1491_v25 = vld [vmem:[%s2041_s3 + $0x28] sm:$0xff] (!%p371_p9)   ;;  %v1492_v26 = vld [vmem:[%s2041_s3 + $0x30] sm:$0xff] (!%p371_p9)   ;;  %v1493_v27 = vld [vmem:[%s2041_s3 + $0x38] sm:$0xff] (!%p371_p9)   ;;  %s2052_s17 = sshll.u32 (!%p371_p9), %s1709_s25, 7 }
  0x17   : > { %1340 = vmatpush3.bf16.msra.mxu1 (!%p371_p9), %v1486_v20  ;;  %v1494_v32 = vld [vmem:[%s2044_s6] sm:$0xff] (!%p371_p9)   ;;  %v1496_v34 = vld [vmem:[%s2044_s6 + $0x8] sm:$0xff] (!%p371_p9)   ;;  %v1498_v36 = vld [vmem:[%s2044_s6 + $0x10] sm:$0xff] (!%p371_p9)   ;;  %v1620_v62 = vmov (!%p371_p9), 1.0|1.0   ;;  %s1965_s28 = scalar_lea.hbm (!%p371_p9), %s2049_s11, %s2052_s17 }
  0x18   : > { %vm648_vm1 = vcmp.ge.s32.totalorder (!%p371_p9), %v1784_v12, 1  ;;  %vm649_vm2 = vcmp.lt.s32.totalorder (!%p371_p9), %v1784_v12, 16  ;;  %1341 = vmatprep.subr.bf16.mxu1 (!%p371_p9), %v1618_v1  ;;  %v1495_v33 = vld [vmem:[%s2043_s5] sm:$0xff] (!%p371_p9)   ;;  %v1497_v35 = vld [vmem:[%s2043_s5 + $0x8] sm:$0xff] (!%p371_p9)   ;;  %v1499_v37 = vld [vmem:[%s2043_s5 + $0x10] sm:$0xff] (!%p371_p9)  }
  0x19   : > { %vm650_vm3 = vmand (!%p371_p9), %vm648_vm1, %vm649_vm2  ;;  %v1500_v38 = vld [vmem:[%s2044_s6 + $0x18] sm:$0xff] (!%p371_p9)   ;;  %v1502_v40 = vld [vmem:[%s2044_s6 + $0x20] sm:$0xff] (!%p371_p9)  }
  0x1a   : > { %v1478_v0 = vld [vmem:[%s2059_s1] sm:$0xff] (!%p371_p9)   ;;  %v1479_v2 = vld [vmem:[%s2059_s1 + $0x8] sm:$0xff] (!%p371_p9)   ;;  %v1480_v3 = vld [vmem:[%s2059_s1 + $0x10] sm:$0xff] (!%p371_p9)  }
  0x1b   : > { %1320 = vmatpush3.bf16.msra.mxu0 (!%p371_p9), %v1478_v0  ;;  %v1481_v4 = vld [vmem:[%s2059_s1 + $0x18] sm:$0xff] (!%p371_p9)   ;;  %v1482_v5 = vld [vmem:[%s2059_s1 + $0x20] sm:$0xff] (!%p371_p9)   ;;  %v1483_v6 = vld [vmem:[%s2059_s1 + $0x28] sm:$0xff] (!%p371_p9)   ;;  %1342 = vmatpush3.bf16.msra.mxu1 (!%p371_p9), %v1487_v21 }
  0x1c   : > { %1321 = vmatprep.subr.bf16.mxu0 %v1618_v1  ;;  %s417_s19 = scalar_select %p416_p10, %s1709_s25, 1  ;;  %v1484_v7 = vld [vmem:[%s2059_s1 + $0x30] sm:$0xff]   ;;  %v1485_v8 = vld [vmem:[%s2059_s1 + $0x38] sm:$0xff]   ;;  %v1211_v13 = vld [vmem:[%s2061_s2] ss:$0 sm:$0xff]  ;;  %1343 = vmatprep.subr.bf16.mxu1 %v1618_v1 }
  0x1d   : > { %v1501_v39 = vld [vmem:[%s2043_s5 + $0x18] sm:$0xff]   ;;  %v1503_v41 = vld [vmem:[%s2043_s5 + $0x20] sm:$0xff]   ;;  %v1504_v42 = vld [vmem:[%s2044_s6 + $0x28] sm:$0xff]  }
  0x1e   : > { %s1210_s15 = sshll.u32 %s417_s19, 3  ;;  %v1505_v43 = vld [vmem:[%s2043_s5 + $0x28] sm:$0xff]   ;;  %v1506_v44 = vld [vmem:[%s2044_s6 + $0x30] sm:$0xff]   ;;  %v1508_v50 = vld [vmem:[%s2044_s6 + $0x38] sm:$0xff]  }
  0x1f   : > { %1322 = vmatpush3.bf16.msra.mxu0 %v1479_v2  ;;  %s419_s16 = scalar_lea.vmem %s2060_s0, %s1210_s15  ;;  %s1787_s15 = sand.u32 1, %s1608_s22   ;;  %1344 = vmatpush3.bf16.msra.mxu1 %v1488_v22  ;;  %v1507_v45 = vld [vmem:[%s2043_s5 + $0x30] sm:$0xff]   ;;  %v1509_v51 = vld [vmem:[%s2043_s5 + $0x38] sm:$0xff]   ;;  %v1510_v61 = vld [vmem:[%s2045_s7] sm:$0xff]  }
  0x20   : > { %1323 = vmatprep.subr.bf16.mxu0 %v1618_v1  ;;  %v421_v9 = vld [vmem:[%s419_s16] sm:$0xff]  ;;  %s2051_s30 = sshll.u32 %s1787_s15, 3  ;;  %1345 = vmatprep.subr.bf16.mxu1 %v1618_v1  ;;  %v1511_v63 = vld [vmem:[%s2045_s7 + $0x8] sm:$0xff]   ;;  %v1512_v0 = vld [vmem:[%s2045_s7 + $0x10] sm:$0xff]   ;;  %s1082_s19 = scalar_lea.sflag [#allocation3], %s1787_s15 }
  0x21   : > { %v1778_v10 = vpack.c.bf16 %v421_v9, %v421_v9  ;;  %s1797_s26 = scalar_lea.vmem [#allocation2], %s2051_s30  ;;  %v1513_v2 = vld [vmem:[%s2045_s7 + $0x18] sm:$0xff]   ;;  %s1621_s16 = smov [#allocation2]  }
  0x22   : > { %s1100_s30 = sshll.u32 %s1797_s26, 4  ;;  %s1526_s0 = sshll.u32 %s1621_s16, 4  ;;  %s1101_s30 = int_to_ptr.vmem [resolvable:$true] %s1100_s30  ;;  %s1527_s0 = int_to_ptr.vmem [resolvable:$false] %s1526_s0 }
  0x23   : > { %1324 = vmatpush3.bf16.msra.mxu0 %v1480_v3  ;;  %1346 = vmatpush3.bf16.msra.mxu1 %v1489_v23  ;;  %v1514_v3 = vld [vmem:[%s2045_s7 + $0x20] sm:$0xff]   ;;  %s1522_s29 = scalar_lea.vmem %s1101_s30, 128  ;;  %s1528_s1 = scalar_lea.vmem %s1527_s0, 256 }
  0x24   : > { %1325 = vmatprep.subr.bf16.mxu0 %v1618_v1  ;;  %1347 = vmatprep.subr.bf16.mxu1 %v1618_v1  ;;  %p1523_p11 = scmp.ne.s32.totalorder %s1101_s30, %s1522_s29  ;;  %p1529_p0 = scmp.lt.s32.totalorder %s1101_s30, %s1527_s0 }
  0x25   : > { %p1530_p1 = scmp.lt.s32.totalorder %s1528_s1, %s1522_s29 }
  0x26   : > { %p1524_p12 = pnand %p1523_p11, %p1726_p5 }
  0x27   : > { %1326 = vmatpush3.bf16.msra.mxu0 %v1481_v4  ;;  %1348 = vmatpush3.bf16.msra.mxu1 %v1490_v24  ;;  %v1515_v4 = vld [vmem:[%s2045_s7 + $0x28] sm:$0xff]   ;;  %v1256_v24 = vld [vmem:[%s2046_s8] ss:$0 sm:$0xff]  ;;  %p1531_p2 = por %p1530_p1, %p1529_p0 }
  0x28   : > { %1327 = vmatprep.subr.bf16.mxu0 %v1618_v1  ;;  %1349 = vmatprep.subr.bf16.mxu1 %v1618_v1  ;;  %p1525_p13 = pneg %p1524_p12 }
  0x2a   : > { %p1532_p3 = pnand %p1531_p2, %p1525_p13 }
  0x2b   : > { %1328 = vmatpush3.bf16.msra.mxu0 %v1482_v5  ;;  %1350 = vmatpush3.bf16.msra.mxu1 %v1491_v25  ;;  %v1220_v5 = vld [vmem:[%s2042_s4] ss:$0 sm:$0xff] }
  0x2c   : > { %1329 = vmatprep.subr.bf16.mxu0 %v1618_v1  ;;  %1351 = vmatprep.subr.bf16.mxu1 %v1618_v1 }
  0x2f   : > { %1330 = vmatpush3.bf16.msra.mxu0 %v1483_v6  ;;  %1352 = vmatpush3.bf16.msra.mxu1 %v1492_v26  ;;  %v1516_v6 = vld [vmem:[%s2045_s7 + $0x30] sm:$0xff]  }
  0x30   : > { %1331 = vmatprep.subr.bf16.mxu0 %v1618_v1  ;;  %1353 = vmatprep.subr.bf16.mxu1 %v1618_v1 }
  0x33   : > { %1332 = vmatpush3.bf16.msra.mxu0 %v1484_v7  ;;  %1354 = vmatpush3.bf16.msra.mxu1 %v1493_v27 }
  0x34   : > { %1333 = vmatprep.subr.bf16.mxu0 %v1618_v1  ;;  %1379 = vmatprep.subr.bf16.mxu1 %v1618_v1 }
  0x36   : > { %1356 = vmatmul.mubr.bf16.vlgmr.msra.gmra.mrb[0].mxu1 %v1778_v10 }
  0x37   : > { %1334 = vmatpush3.bf16.msra.mxu0 %v1485_v8  ;;  %1395 = vmatprep.mubr.msk.bf16.mxu1 %vm1619_vm0, %v1618_v1  ;;  %v1517_v8 = vld [vmem:[%s2045_s7 + $0x38] sm:$0xff]  }
  0x38   : > { %1359 = vmatprep.subr.bf16.mxu0 %v1618_v1  ;;  %1380 = vmatpush3.bf16.msra.mxu1 %v1495_v33 }
  0x39   : > { %1381 = vmatprep.subr.bf16.mxu1 %v1618_v1 }
  0x3a   : > { %1336 = vmatmul.mubr.bf16.vlgmr.msra.gmra.mrb[0].mxu0 %v1778_v10 }
  0x3b   : > { %1375 = vmatprep.mubr.msk.bf16.mxu0 %vm1619_vm0, %v1618_v1  ;;  %1360 = vmatpush3.bf16.msra.mxu0 %v1494_v32 }
  0x3c   : > { %1361 = vmatprep.subr.bf16.mxu0 %v1618_v1  ;;  %1382 = vmatpush3.bf16.msra.mxu1 %v1497_v35 }
  0x3d   : > { %1383 = vmatprep.subr.bf16.mxu1 %v1618_v1 }
  0x3f   : > { %1362 = vmatpush3.bf16.msra.mxu0 %v1496_v34 }
  0x40   : > { %1363 = vmatprep.subr.bf16.mxu0 %v1618_v1  ;;  %1384 = vmatpush3.bf16.msra.mxu1 %v1499_v37 }
  0x41   : > { %1385 = vmatprep.subr.bf16.mxu1 %v1618_v1 }
  0x43   : > { %1364 = vmatpush3.bf16.msra.mxu0 %v1498_v36 }
  0x44   : > { %1365 = vmatprep.subr.bf16.mxu0 %v1618_v1  ;;  %1386 = vmatpush3.bf16.msra.mxu1 %v1501_v39 }
  0x45   : > { %1387 = vmatprep.subr.bf16.mxu1 %v1618_v1 }
  0x47   : > { %1366 = vmatpush3.bf16.msra.mxu0 %v1500_v38 }
  0x48   : > { %1367 = vmatprep.subr.bf16.mxu0 %v1618_v1  ;;  %1388 = vmatpush3.bf16.msra.mxu1 %v1503_v41 }
  0x49   : > { %1389 = vmatprep.subr.bf16.mxu1 %v1618_v1 }
  0x4b   : > { %1368 = vmatpush3.bf16.msra.mxu0 %v1502_v40 }
  0x4c   : > { %1369 = vmatprep.subr.bf16.mxu0 %v1618_v1  ;;  %1390 = vmatpush3.bf16.msra.mxu1 %v1505_v43 }
  0x4d   : > { %1391 = vmatprep.subr.bf16.mxu1 %v1618_v1 }
  0x4f   : > { %1370 = vmatpush3.bf16.msra.mxu0 %v1504_v42 }
  0x50   : > { %1371 = vmatprep.subr.bf16.mxu0 %v1618_v1  ;;  %1392 = vmatpush3.bf16.msra.mxu1 %v1507_v45 }
  0x51   : > { %1393 = vmatprep.subr.bf16.mxu1 %v1618_v1 }
  0x53   : > { %1372 = vmatpush3.bf16.msra.mxu0 %v1506_v44 }
  0x54   : > { %1373 = vmatprep.subr.bf16.mxu0 %v1618_v1  ;;  %1394 = vmatpush3.bf16.msra.mxu1 %v1509_v51 }
  0x55   : > { %1419 = vmatprep.subr.bf16.mxu1 %v1618_v1 }
  0x57   : > { %1374 = vmatpush3.bf16.msra.mxu0 %v1508_v50  ;;  %1396 = vmatmul.mubr.bf16.vlgmr.msra.gmra.mrb[4].mxu1 %v1778_v10 }
  0x58   : > { %1399 = vmatprep.subr.bf16.mxu0 %v1618_v1  ;;  %1427 = vmatprep.mubr.msk.bf16.mxu1 %vm1619_vm0, %v1618_v1 }
 0x109   : > { %v640_v52 = vpop.f32.mrb[0].mxu1 }
 0x10a   : > { %v1357_v53 = vpop.f32.mrb[1].mxu1  ;;  %v641_v7 = vadd.f32 %v1220_v5, %v640_v52 }
 0x10b   : > { %v643_v54 = vpop.f32.mrb[2].mxu1 }
 0x10c   : > { %v1358_v55 = vpop.f32.mrb[3].mxu1  ;;  %v882_v9 = vpack.c.bf16 %v641_v7, %v641_v7 }
 0x10d   : > { %v528_v14 = vpop.f32.mrb[0].mxu0 }
 0x10e   : > { %v529_v15 = vadd.f32 %v1211_v13, %v528_v14  ;;  %v1337_v16 = vpop.f32.mrb[1].mxu0  ;;  %v1518_v13 = vld [vmem:[%s2047_s9] sm:$0xff]  }
 0x10f   : > { %v531_v17 = vpop.f32.mrb[2].mxu0  ;;  %1420 = vmatpush3.bf16.msra.mxu1 %v1518_v13  ;;  %v1520_v16 = vld [vmem:[%s2047_s9 + $0x10] sm:$0xff]  }
 0x110   : > { %534 = vst [vmem:[%s1797_s26] sm:$0xff] %v529_v15  ;;  %v1338_v18 = vpop.f32.mrb[3].mxu0  ;;  %v651_v19 = vsel %vm650_vm3, %v529_v15, -1e+30  ;;  %v1519_v15 = vld [vmem:[%s2047_s9 + $0x8] sm:$0xff]   ;;  %1421 = vmatprep.subr.bf16.mxu1 %v1618_v1  ;;  %v1521_v17 = vld [vmem:[%s2047_s9 + $0x18] sm:$0xff]  }
 0x111   : > { %652 = vmax.xlane.f32.xlu0 %v651_v19 }
 0x113   : > { %1422 = vmatpush3.bf16.msra.mxu1 %v1519_v15 }
 0x114   : > { %1423 = vmatprep.subr.bf16.mxu1 %v1618_v1 }
 0x117   : > { %1424 = vmatpush3.bf16.msra.mxu1 %v1520_v16 }
 0x118   : > { %1425 = vmatprep.subr.bf16.mxu1 %v1618_v1 }
 0x11b   : > { %1426 = vmatpush3.bf16.msra.mxu1 %v1521_v17 }
 0x12a   : > { %v876_v10 = vpop.f32.mrb[4].mxu1 }
 0x12b   : > { %v1397_v11 = vpop.f32.mrb[5].mxu1 }
 0x19e   : > { %v653_v28 = vpop.xlane.xlu0 %652 }
 0x19f   : > { %vm654_vm4 = vcmp.ge.f32.partialorder %v651_v19, %v653_v28 }
 0x1a0   : > { %v655_v29 = vsel %vm654_vm4, %v1784_v12, 128 }
 0x1a1   : > { %v657_v30 = vshra.s32 %v655_v29, 16  ;;  %v656_v46 = vand.u32 65535, %v655_v29 }
 0x1a3   : > { %v659_v31 = vcvt.s32.f32 %v657_v30  ;;  %v658_v48 = vcvt.s32.f32 %v656_v46 }
 0x1a5   : > { %660 = vmin.xlane.f32.xlu0 %v659_v31 }
 0x232   : > { %v661_v47 = vpop.xlane.xlu0 %660 }
 0x233   : > { %vm662_vm5 = vcmp.eq.f32.partialorder %v659_v31, %v661_v47  ;;  %v667_v56 = vcvt.f32.s32 %v661_v47 }
 0x234   : > { %v663_v49 = vsel %vm662_vm5, %v658_v48, inf }
 0x235   : > { %664 = vmin.xlane.f32.xlu1 %v663_v49  ;;  %v668_v58 = vshll.u32 %v667_v56, 16 }
 0x2c2   : > { %v665_v57 = vpop.xlane.xlu1 %664 }
 0x2c3   : > { %v666_v59 = vcvt.f32.s32 %v665_v57 }
 0x2c5   : > { %v669_v60 = vadd.s32 %v668_v58, %v666_v59 }
 0x2c7   : > { %vm670_vm6 = vcmp.eq.s32.totalorder %v1784_v12, %v669_v60  ;;  %v879_v12 = vpop.f32.mrb[6].mxu1 }
 0x2c8   : > { %vm1238_vm7 = vmpackc.low %vm670_vm6, %vm670_vm6  ;;  %v1398_v14 = vpop.f32.mrb[7].mxu1 }
 0x2c9   : > { %1376 = vmatmul.mubr.msk.bf16.vlgmr.msra.gmra.mrb[4].mxu0 %vm1238_vm7, %v1620_v62 }
 0x2ca   : > { %1400 = vmatpush3.bf16.msra.mxu0 %v1510_v61  ;;  %1415 = vmatprep.mubr.msk.bf16.mxu0 %vm1619_vm0, %v1618_v1 }
 0x2cb   : > { %1401 = vmatprep.subr.bf16.mxu0 %v1618_v1 }
 0x2ce   : > { %1402 = vmatpush3.bf16.msra.mxu0 %v1511_v63 }
 0x2cf   : > { %1403 = vmatprep.subr.bf16.mxu0 %v1618_v1 }
 0x2d2   : > { %1404 = vmatpush3.bf16.msra.mxu0 %v1512_v0 }
 0x2d3   : > { %1405 = vmatprep.subr.bf16.mxu0 %v1618_v1 }
 0x2d6   : > { %1406 = vmatpush3.bf16.msra.mxu0 %v1513_v2 }
 0x2d7   : > { %1407 = vmatprep.subr.bf16.mxu0 %v1618_v1 }
 0x2da   : > { %1408 = vmatpush3.bf16.msra.mxu0 %v1514_v3 }
 0x2db   : > { %1409 = vmatprep.subr.bf16.mxu0 %v1618_v1 }
 0x2de   : > { %1410 = vmatpush3.bf16.msra.mxu0 %v1515_v4 }
 0x2df   : > { %1411 = vmatprep.subr.bf16.mxu0 %v1618_v1 }
 0x2e2   : > { %1412 = vmatpush3.bf16.msra.mxu0 %v1516_v6 }
 0x2e3   : > { %1413 = vmatprep.subr.bf16.mxu0 %v1618_v1 }
 0x2e6   : > { %1414 = vmatpush3.bf16.msra.mxu0 %v1517_v8 }
 0x2e9   : > { %1416 = vmatmul.mubr.bf16.vlgmr.msra.gmra.mrb[8].mxu0 %v882_v9 }
 0x39c   : > { %v788_v18 = vpop.f32.mrb[4].mxu0 }
 0x39d   : > { %v877_v19 = vadd.f32 %v876_v10, %v788_v18  ;;  %v1377_v20 = vpop.f32.mrb[5].mxu0 }
 0x39e   : > { %v791_v21 = vpop.f32.mrb[6].mxu0 }
 0x39f   : > { %v1378_v22 = vpop.f32.mrb[7].mxu0 }
 0x3bc   : > { %v981_v23 = vpop.f32.mrb[8].mxu0 }
 0x3bd   : > { %v987_v1 = vadd.f32 %v981_v23, %v877_v19  ;;  %v1417_v25 = vpop.f32.mrb[9].mxu0 }
 0x3be   : > { %v984_v26 = vpop.f32.mrb[10].mxu0 }
 0x3bf   : > { %v995_v27 = vadd.f32 %v1256_v24, %v987_v1  ;;  %v1418_v28 = vpop.f32.mrb[11].mxu0 }
 0x3c1   : > { %v996_v29 = vpack.c.bf16 %v995_v27, %v995_v27 }
 0x3c3   : > { %1428 = vmatmul.mubr.msk.bf16.vlgmr.msra.gmra.mrb[8].mxu1 %vm1036_vm8, %v996_v29 }
 0x3c4   : > { %1535 = shalt.err (!%p1532_p3)
}
 0x3c5   : > { %s1536_s26 = scalar_lea.hbm %s1965_s28, 128  ;;  %s1540_s16 = scalar_lea.hbm %s2049_s11, 256 }
 0x3c6   : > { %p1537_p4 = scmp.ne.s32.totalorder %s1965_s28, %s1536_s26  ;;  %p1541_p9 = scmp.lt.u32.totalorder %s1965_s28, %s2049_s11 }
 0x3c7   : > { %p1542_p10 = scmp.lt.u32.totalorder %s1540_s16, %s1536_s26  ;;  %p1544_p12 = scmp.lt.u32.totalorder %s1536_s26, %s1965_s28 }
 0x3c8   : > { %p1538_p7 = pnand %p1537_p4, %p1726_p5 }
 0x3c9   : > { %p1543_p11 = por %p1542_p10, %p1541_p9 }
 0x3ca   : > { %p1539_p8 = pneg %p1538_p7 }
 0x3cb   : > { %p1545_p13 = por %p1544_p12, %p1543_p11 }
 0x3cd   : > { %p1546_p0 = pnand %p1545_p13, %p1539_p8 }
 0x3cf   : > { %1549 = shalt.err (!%p1546_p0)
}
 0x3d0   : > { %1431 = dma.vmem_to_hbm [thread:$0]  (%p1726_p5), %s1101_s30, 128, %s1965_s28, %s1082_s19   ;;  %v1257_v30 = vld [vmem:[%s2048_s10] ss:$0 sm:$0xff] }
 0x3d1   : > { %s2062_s17 = sshll.u32 %s1787_s15, 3  ;;  %s2063_s26 = sshll.u32 %s1709_s25, 7 }
 0x3d2   : > { %s415_s18 = scalar_lea.vmem [#allocation4], %s2062_s17  ;;  %s1995_s2 = scalar_lea.hbm %s2050_s12, %s2063_s26 }
 0x3d3   : > { %s1113_s20 = sshll.u32 %s415_s18, 4  ;;  %s1087_s30 = scalar_lea.sflag [#allocation5], %s1787_s15  ;;  %s1997_s20 = int_to_ptr.vmem [resolvable:$true] %s1113_s20 }
 0x3d4   : > { %s1550_s28 = scalar_lea.vmem %s1997_s20, 128  ;;  %s1622_s25 = smov [#allocation4]  }
 0x3d5   : > { %p1551_p1 = scmp.ne.s32.totalorder %s1997_s20, %s1550_s28  ;;  %s1554_s19 = sshll.u32 %s1622_s25, 4  ;;  %s1555_s19 = int_to_ptr.vmem [resolvable:$false] %s1554_s19 }
 0x3d6   : > { %s1556_s1 = scalar_lea.vmem %s1555_s19, 256  ;;  %p1557_p4 = scmp.lt.s32.totalorder %s1997_s20, %s1555_s19 }
 0x3d7   : > { %p1552_p2 = pnand %p1551_p1, %p1726_p5  ;;  %p1558_p7 = scmp.lt.s32.totalorder %s1556_s1, %s1550_s28 }
 0x3d9   : > { %p1553_p3 = pneg %p1552_p2  ;;  %p1559_p8 = por %p1558_p7, %p1557_p4 }
 0x3db   : > { %p1560_p9 = pnand %p1559_p8, %p1553_p3 }
 0x496   : > { %v1074_v31 = vpop.f32.mrb[8].mxu1 }
 0x497   : > { %v1075_v32 = vadd.f32 %v1257_v30, %v1074_v31  ;;  %v1429_v33 = vpop.f32.mrb[9].mxu1 }
 0x498   : > { %v1077_v34 = vpop.f32.mrb[10].mxu1 }
 0x499   : > { %1080 = vst [vmem:[%s415_s18] sm:$0xff] %v1075_v32  ;;  %v1430_v35 = vpop.f32.mrb[11].mxu1 }
 0x49a   : > { %1563 = shalt.err (!%p1560_p9)
}
 0x49b   : > { %s1564_s15 = scalar_lea.hbm %s1995_s2, 128  ;;  %s1568_s18 = scalar_lea.hbm %s2050_s12, 256 }
 0x49c   : > { %p1565_p10 = scmp.ne.s32.totalorder %s1995_s2, %s1564_s15  ;;  %p1569_p13 = scmp.lt.u32.totalorder %s1995_s2, %s2050_s12 }
 0x49d   : > { %p1570_p0 = scmp.lt.u32.totalorder %s1568_s18, %s1564_s15  ;;  %p1572_p2 = scmp.lt.u32.totalorder %s1564_s15, %s1995_s2 }
 0x49e   : > { %p1566_p11 = pnand %p1565_p10, %p1726_p5 }
 0x49f   : > { %p1571_p1 = por %p1570_p0, %p1569_p13 }
 0x4a0   : > { %p1567_p12 = pneg %p1566_p11 }
 0x4a1   : > { %p1573_p3 = por %p1572_p2, %p1571_p1 }
 0x4a3   : > { %p1574_p4 = pnand %p1573_p3, %p1567_p12 }
 0x4a5   : > { %1577 = shalt.err (!%p1574_p4)
}
 0x4a6   : > { %1432 = dma.vmem_to_hbm [thread:$0]  (%p1726_p5), %s1997_s20, 128, %s1995_s2, %s1087_s30  }
 0x4a7 PF: > { %p1442_p7 = scmp.ge.s32.totalorder %s1616_s24, 2  ;;  %s1125_s0 = sand.u32 1, %s1604_s21  }
 0x4a8   : > { %s1126_s28 = scalar_lea.sflag [#allocation3], %s1125_s0 }
 0x4a9   : > { %p1436_p8 = pnand %p1442_p7, %p1730_p6 }
 0x4ab   : > { %1595 = dma.done.wait (!%p1436_p8), %s1126_s28, 128  }
 0x4ac   : > { %1597 = vsyncadd (!%p1436_p8), %s1126_s28, 4294967168  ;;  %s1135_s25 = scalar_lea.sflag [#allocation5], %s1125_s0 }
 0x4ad   : > { %1599 = dma.done.wait (!%p1436_p8), %s1135_s25, 128  }
 0x4ae   : > { %1601 = vsyncadd (!%p1436_p8), %s1135_s25, 4294967168  ;;  %s2064_s13 = sld [smem:[#allocation8_spill]]  ;;  %p26_p5 = scmp.ge.s32.totalorder %s1713_s27, 4  }
 0x4af   : > { %s2065_s21 = smov %s1608_s22  ;;  %s2066_s22 = smov %s1612_s23 }
 0x4b0   : > { %s2068_s24 = smov %s1713_s27  ;;  %28 = sbr.rel (!%p26_p5) target bundleno = 9 (0x9), region = 116 }
 0x4b4   : > { %s2067_s23 = smov %s2064_s13 }
 0x4b7   :  { %1140 = vsyncpa [#allocation3], 1 }
 0x4b8   :  { %1142 = vsyncpa [#allocation3 + $0x1], 1 }
 0x4b9   :  { %1143 = vsyncpa [#allocation5], 1 }
 0x4ba   :  { %1145 = vsyncpa [#allocation5 + $0x1], 1 }

</bundles_post_ra>
